<compile_context>
chip_gen: v7x
topology: tpu7x:2x2x1
jax: 0.10.0
libtpu: 0.0.40
codegen_flags: <defaults>
</compile_context>

<pallas_src>
import math
import functools

import jax
import jax.numpy as jnp
from jax.experimental import pallas as pl
from jax.experimental.pallas import tpu as pltpu


LANE = 128       # lane width: feature dims padded to multiples of this
SUBLANE = 16     # batch-tile granularity (covers f32 (8) and bf16 (16) packing)


def _round_up(x, m):
    return (x + m - 1) // m * m


# ----------------------------------------------------------------------------
# Pallas kernel: fused MLP forward over one batch tile
# ----------------------------------------------------------------------------
def _mlp_kernel(x_ref, w_in_ref, b_in_ref, w_hid_ref, b_hid_ref,
                w_out_ref, b_out_ref, o_ref, *, n_hidden):
    cdt = w_in_ref.dtype  # compute (MXU input) dtype, e.g. bfloat16

    # input layer + ReLU (MXU matmul, f32 accumulation, f32 bias add)
    h = jnp.dot(x_ref[...], w_in_ref[...], preferred_element_type=jnp.float32)
    h = jnp.maximum(h + b_in_ref[...], 0.0)

    # hidden layers + ReLU (static unroll; n_hidden = depth - 1)
    for i in range(n_hidden):
        h = jnp.dot(h.astype(cdt), w_hid_ref[i], preferred_element_type=jnp.float32)
        h = jnp.maximum(h + b_hid_ref[i], 0.0)

    # output layer (no activation); 128-padded lane-dense store
    out = jnp.dot(h.astype(cdt), w_out_ref[...], preferred_element_type=jnp.float32)
    o_ref[...] = (out + b_out_ref[...]).astype(o_ref.dtype)


# ----------------------------------------------------------------------------
# Wrapper: padding, tiling, VMEM budgeting, pallas_call
# ----------------------------------------------------------------------------
def dqm_forward(x, params, *, batch_tile=None, compute_dtype=jnp.bfloat16):
    """Run the DQM_model forward pass with a single fused Pallas kernel.

    x:       [B, input_dim] float32
    params:  dict with
        'w_in'  [input_dim, hidden_dim]     'b_in'  [1, hidden_dim]
        'w_hid' [depth-1, hidden, hidden]   'b_hid' [depth-1, 1, hidden]
        'w_out' [hidden_dim, output_dim]    'b_out' [1, output_dim]
    """
    B, D_in = x.shape
    H = params["w_in"].shape[1]
    D_out = params["w_out"].shape[1]
    n_hidden = params["w_hid"].shape[0]
    # TODO(synk): support depth == 1 (no hidden layers) via an empty-stack path.
    assert n_hidden >= 1, "this kernel assumes depth >= 2 (at least one hidden layer)"

    cdt = jnp.dtype(compute_dtype)
    out_dtype = x.dtype

    # ---- lane/feature padding (zero-pad; padded units stay exactly 0 through ReLU)
    D_in_p = _round_up(D_in, LANE)
    H_p = _round_up(H, LANE)
    D_out_p = _round_up(D_out, LANE)

    # ---- batch tiling: many-step grid so x/out DMAs pipeline & megacore can shard
    if batch_tile is None:
        batch_tile = 256 if B >= 256 else B   # 256 matches v6e/v7x 256-wide MXU M dim
    tb = _round_up(max(1, min(batch_tile, B)), SUBLANE)
    B_p = _round_up(B, tb)
    grid = (B_p // tb,)

    # ---- pad + cast parameters (weights -> compute dtype, biases stay f32)
    w_in = jnp.pad(params["w_in"], ((0, D_in_p - D_in), (0, H_p - H))).astype(cdt)
    w_hid = jnp.pad(params["w_hid"], ((0, 0), (0, H_p - H), (0, H_p - H))).astype(cdt)
    w_out = jnp.pad(params["w_out"], ((0, H_p - H), (0, D_out_p - D_out))).astype(cdt)
    b_in = jnp.pad(params["b_in"], ((0, 0), (0, H_p - H))).astype(jnp.float32)
    b_hid = jnp.pad(params["b_hid"], ((0, 0), (0, 0), (0, H_p - H))).astype(jnp.float32)
    b_out = jnp.pad(params["b_out"], ((0, 0), (0, D_out_p - D_out))).astype(jnp.float32)

    x_p = jnp.pad(x, ((0, B_p - B), (0, D_in_p - D_in))).astype(cdt)

    # ---- VMEM budget (sized against v7x's 64 MiB VMEM per TensorCore)
    w_bytes = (w_in.size + w_hid.size + w_out.size) * cdt.itemsize
    b_bytes = (b_in.size + b_hid.size + b_out.size) * 4
    io_bytes = 2 * tb * (D_in_p * cdt.itemsize + D_out_p * jnp.dtype(out_dtype).itemsize)
    act_bytes = 2 * tb * H_p * 4                         # f32 activation working set
    resident = 2 * (w_bytes + b_bytes) + io_bytes + act_bytes  # 2x: Pallas double-buffers inputs
    if 2 * (w_bytes + b_bytes) > 48 * 1024 * 1024:
        # TODO(synk): stream w_hid over an extra grid axis / pltpu.emit_pipeline for
        # very large hidden sizes instead of keeping all hidden weights resident.
        raise ValueError(
            "resident (double-buffered) weights exceed the ~48 MiB budget that fits "
            "v7x VMEM; reduce hidden size/depth or stream w_hid over a layer axis")
    vmem_limit = int(min(max(resident * 3 // 2, 32 * 1024 * 1024), 112 * 1024 * 1024))

    # ---- cost estimate so XLA schedules this custom call sensibly
    flops = 2 * B_p * (D_in_p * H_p + n_hidden * H_p * H_p + H_p * D_out_p)
    bytes_accessed = (x_p.size * cdt.itemsize + w_bytes + b_bytes
                      + B_p * D_out_p * jnp.dtype(out_dtype).itemsize)
    cost = pl.CostEstimate(flops=int(flops), transcendentals=0,
                           bytes_accessed=int(bytes_accessed))

    kernel = functools.partial(_mlp_kernel, n_hidden=n_hidden)

    out_p = pl.pallas_call(
        kernel,
        out_shape=jax.ShapeDtypeStruct((B_p, D_out_p), out_dtype),
        grid_spec=pltpu.PrefetchScalarGridSpec(
            num_scalar_prefetch=0,
            grid=grid,
            in_specs=[
                pl.BlockSpec((tb, D_in_p), lambda i: (i, 0)),              # x (batch-tiled)
                # Weights/biases: constant index_map -> same block every grid step,
                # so Pallas keeps them VMEM-resident and does not re-DMA per step.
                pl.BlockSpec((D_in_p, H_p), lambda i: (0, 0)),             # w_in
                pl.BlockSpec((1, H_p), lambda i: (0, 0)),                  # b_in
                pl.BlockSpec((n_hidden, H_p, H_p), lambda i: (0, 0, 0)),   # w_hid
                pl.BlockSpec((n_hidden, 1, H_p), lambda i: (0, 0, 0)),     # b_hid
                pl.BlockSpec((H_p, D_out_p), lambda i: (0, 0)),            # w_out
                pl.BlockSpec((1, D_out_p), lambda i: (0, 0)),              # b_out
            ],
            out_specs=pl.BlockSpec((tb, D_out_p), lambda i: (i, 0)),       # lane-dense store
        ),
        compiler_params=pltpu.CompilerParams(
            dimension_semantics=("parallel",),      # shard batch tiles across v7x's 2 TCs
            vmem_limit_bytes=vmem_limit,
        ),
        cost_estimate=cost,
    )(x_p, w_in, b_in, w_hid, b_hid, w_out, b_out)

    return out_p[:B, :D_out]


# ----------------------------------------------------------------------------
# Deterministic parameter initialization (mirrors the PyTorch module shapes)
# ----------------------------------------------------------------------------
def init_params(key, input_dim, hidden_dim, output_dim, depth,
                noisy=False, std_init=0.5):
    """Build effective [in, out]-layout weights and [1, out] biases.

    noisy=False mimics torch.nn.Linear init; noisy=True builds NoisyLinear's
    effective weight/bias (mu + sigma * factorized-gaussian eps) in plain JAX —
    the Pallas kernel is identical either way.
    """
    assert depth >= 2, "this synthetic setup assumes at least one hidden layer"

    def linear(key, fan_in, fan_out):
        k1, k2 = jax.random.split(key)
        bound = 1.0 / math.sqrt(fan_in)
        w = jax.random.uniform(k1, (fan_in, fan_out), jnp.float32, -bound, bound)
        b = jax.random.uniform(k2, (1, fan_out), jnp.float32, -bound, bound)
        return w, b

    def noisy_linear(key, fan_in, fan_out):
        k1, k2, k3, k4 = jax.random.split(key, 4)
        mu_range = 1.0 / math.sqrt(fan_in)
        w_mu = jax.random.uniform(k1, (fan_in, fan_out), jnp.float32, 0.0, mu_range)
        b_mu = jax.random.uniform(k2, (1, fan_out), jnp.float32, 0.0, mu_range)
        w_sigma = jnp.full((fan_in, fan_out), std_init / math.sqrt(fan_in), jnp.float32)
        b_sigma = jnp.full((1, fan_out), std_init / math.sqrt(fan_out), jnp.float32)

        def scale_noise(k, size):
            z = jax.random.normal(k, (size,), jnp.float32)
            return jnp.sign(z) * jnp.sqrt(jnp.abs(z))

        eps_in = scale_noise(k3, fan_in)
        eps_out = scale_noise(k4, fan_out)
        w_eps = jnp.outer(eps_in, eps_out)          # [in, out] layout
        b_eps = eps_out[None, :]
        return w_mu + w_sigma * w_eps, b_mu + b_sigma * b_eps

    make = noisy_linear if noisy else linear

    keys = jax.random.split(key, depth + 1)
    w_in, b_in = make(keys[0], input_dim, hidden_dim)
    w_hids, b_hids = [], []
    for i in range(depth - 1):
        w, b = make(keys[1 + i], hidden_dim, hidden_dim)
        w_hids.append(w)
        b_hids.append(b)
    w_out, b_out = make(keys[depth], hidden_dim, output_dim)

    return {
        "w_in": w_in, "b_in": b_in,
        "w_hid": jnp.stack(w_hids, axis=0),
        "b_hid": jnp.stack(b_hids, axis=0),
        "w_out": w_out, "b_out": b_out,
    }


# Pure-JAX reference. With compute_dtype set it emulates the kernel's casts
# (bf16 matmul inputs, f32 accumulation, f32 bias add).
def dqm_forward_ref(x, params, compute_dtype=None):
    cast = (lambda a: a) if compute_dtype is None else (lambda a: a.astype(compute_dtype))
    h = jnp.dot(cast(x), cast(params["w_in"]), preferred_element_type=jnp.float32)
    h = jnp.maximum(h + params["b_in"], 0.0)
    for i in range(params["w_hid"].shape[0]):
        h = jnp.dot(cast(h), cast(params["w_hid"][i]), preferred_element_type=jnp.float32)
        h = jnp.maximum(h + params["b_hid"][i], 0.0)
    out = jnp.dot(cast(h), cast(params["w_out"]), preferred_element_type=jnp.float32)
    return (out + params["b_out"]).astype(x.dtype)


if __name__ == "__main__":
    # Small, module-consistent shapes; batch chosen so the grid has 2 pipelined
    # steps with the default 256-row batch tile.
    batch, input_dim, hidden_dim, output_dim, depth = 512, 16, 32, 4, 3

    key = jax.random.PRNGKey(0)
    k_x, k_p, k_pn = jax.random.split(key, 3)
    x = jax.random.normal(k_x, (batch, input_dim), jnp.float32)

    fwd_bf16 = jax.jit(functools.partial(dqm_forward, compute_dtype=jnp.bfloat16))

    # Test both the plain-Linear and NoisyLinear parameterizations (same kernel).
    for noisy, k in ((False, k_p), (True, k_pn)):
        params = init_params(k, input_dim, hidden_dim, output_dim, depth,
                             noisy=noisy, std_init=0.5)
        out = jax.block_until_ready(fwd_bf16(x, params))
        assert out.shape == (batch, output_dim)

        # Tight check vs a reference that emulates the kernel's bf16 casts.
        ref_bf16 = dqm_forward_ref(x, params, compute_dtype=jnp.bfloat16)
        assert jnp.allclose(out, ref_bf16, atol=1e-4, rtol=1e-4), "bf16-emulated mismatch"

        # Loose check vs the pure-f32 reference (module semantics preserved).
        ref_f32 = dqm_forward_ref(x, params)
        assert jnp.allclose(out, ref_f32, atol=5e-2, rtol=5e-2), "f32 reference mismatch"

    # Also exercise the f32 compute path for a near-exact reference comparison.
    params = init_params(k_p, input_dim, hidden_dim, output_dim, depth, noisy=False)
    out_f32 = jax.block_until_ready(
        dqm_forward(x, params, compute_dtype=jnp.float32))
    assert jnp.allclose(out_f32, dqm_forward_ref(x, params), atol=1e-4, rtol=1e-4)

    print("KERNEL_OK")
</pallas_src>

<mosaic_0001>
module attributes {stable_mosaic.version = 11 : i64} {
  func.func @_mlp_kernel(%arg0: i32, %arg1: memref<256x128xbf16, #tpu.memory_space<vmem>>, %arg2: memref<128x128xbf16, #tpu.memory_space<vmem>>, %arg3: memref<1x128xf32, #tpu.memory_space<vmem>>, %arg4: memref<2x128x128xbf16, #tpu.memory_space<vmem>>, %arg5: memref<2x1x128xf32, #tpu.memory_space<vmem>>, %arg6: memref<128x128xbf16, #tpu.memory_space<vmem>>, %arg7: memref<1x128xf32, #tpu.memory_space<vmem>>, %arg8: memref<256x128xf32, #tpu.memory_space<vmem>>) attributes {dimension_semantics = [#tpu.dimension_semantics<parallel>], iteration_bounds = array<i64: 2>, scalar_prefetch = 0 : i64, scratch_operands = 0 : i64, tpu.core_type = #tpu.core_type<tc>, window_params = [{transform_indices = @transform_0, window_bounds = array<i64: 256, 128>}, {pipeline_mode = #tpu.pipeline_mode<synchronous>, transform_indices = @transform_1, window_bounds = array<i64: 128, 128>}, {pipeline_mode = #tpu.pipeline_mode<synchronous>, transform_indices = @transform_2, window_bounds = array<i64: 1, 128>}, {pipeline_mode = #tpu.pipeline_mode<synchronous>, transform_indices = @transform_3, window_bounds = array<i64: 2, 128, 128>}, {pipeline_mode = #tpu.pipeline_mode<synchronous>, transform_indices = @transform_4, window_bounds = array<i64: 2, 1, 128>}, {pipeline_mode = #tpu.pipeline_mode<synchronous>, transform_indices = @transform_5, window_bounds = array<i64: 128, 128>}, {pipeline_mode = #tpu.pipeline_mode<synchronous>, transform_indices = @transform_6, window_bounds = array<i64: 1, 128>}, {transform_indices = @transform_7, window_bounds = array<i64: 256, 128>}]} {
    %c0 = arith.constant 0 : index
    %c0_0 = arith.constant 0 : index
    %0 = vector.load %arg1[%c0, %c0_0] : memref<256x128xbf16, #tpu.memory_space<vmem>>, vector<256x128xbf16>
    %c0_1 = arith.constant 0 : index
    %c0_2 = arith.constant 0 : index
    %1 = vector.load %arg2[%c0_1, %c0_2] : memref<128x128xbf16, #tpu.memory_space<vmem>>, vector<128x128xbf16>
    %cst = arith.constant dense<0.000000e+00> : vector<256x128xf32>
    %2 = tpu.matmul %0, %1, %cst {dimension_numbers = #tpu.dot_dimension_numbers<[1], [0], [0], [1], [0, 0, 1, 1], [], []>} : vector<256x128xbf16>, vector<128x128xbf16>, vector<256x128xf32> -> vector<256x128xf32>
    %c0_3 = arith.constant 0 : index
    %c0_4 = arith.constant 0 : index
    %3 = vector.load %arg3[%c0_3, %c0_4] : memref<1x128xf32, #tpu.memory_space<vmem>>, vector<1x128xf32>
    %4 = vector.broadcast %3 : vector<1x128xf32> to vector<256x128xf32>
    %5 = arith.addf %2, %4 : vector<256x128xf32>
    %cst_5 = arith.constant 0.000000e+00 : f32
    %6 = vector.broadcast %cst_5 : f32 to vector<256x128xf32>
    %7 = arith.maximumf %5, %6 : vector<256x128xf32>
    %8 = arith.truncf %7 : vector<256x128xf32> to vector<256x128xbf16>
    %c0_6 = arith.constant 0 : index
    %c0_7 = arith.constant 0 : index
    %c0_8 = arith.constant 0 : index
    %9 = vector.load %arg4[%c0_6, %c0_7, %c0_8] : memref<2x128x128xbf16, #tpu.memory_space<vmem>>, vector<1x128x128xbf16>
    %10 = vector.shape_cast %9 : vector<1x128x128xbf16> to vector<128x128xbf16>
    %cst_9 = arith.constant dense<0.000000e+00> : vector<256x128xf32>
    %11 = tpu.matmul %8, %10, %cst_9 {dimension_numbers = #tpu.dot_dimension_numbers<[1], [0], [0], [1], [0, 0, 1, 1], [], []>} : vector<256x128xbf16>, vector<128x128xbf16>, vector<256x128xf32> -> vector<256x128xf32>
    %c0_10 = arith.constant 0 : index
    %c0_11 = arith.constant 0 : index
    %c0_12 = arith.constant 0 : index
    %12 = vector.load %arg5[%c0_10, %c0_11, %c0_12] : memref<2x1x128xf32, #tpu.memory_space<vmem>>, vector<1x1x128xf32>
    %13 = vector.shape_cast %12 : vector<1x1x128xf32> to vector<1x128xf32>
    %14 = vector.broadcast %13 : vector<1x128xf32> to vector<256x128xf32>
    %15 = arith.addf %11, %14 : vector<256x128xf32>
    %cst_13 = arith.constant 0.000000e+00 : f32
    %16 = vector.broadcast %cst_13 : f32 to vector<256x128xf32>
    %17 = arith.maximumf %15, %16 : vector<256x128xf32>
    %18 = arith.truncf %17 : vector<256x128xf32> to vector<256x128xbf16>
    %c1 = arith.constant 1 : index
    %c0_14 = arith.constant 0 : index
    %c0_15 = arith.constant 0 : index
    %19 = vector.load %arg4[%c1, %c0_14, %c0_15] : memref<2x128x128xbf16, #tpu.memory_space<vmem>>, vector<1x128x128xbf16>
    %20 = vector.shape_cast %19 : vector<1x128x128xbf16> to vector<128x128xbf16>
    %cst_16 = arith.constant dense<0.000000e+00> : vector<256x128xf32>
    %21 = tpu.matmul %18, %20, %cst_16 {dimension_numbers = #tpu.dot_dimension_numbers<[1], [0], [0], [1], [0, 0, 1, 1], [], []>} : vector<256x128xbf16>, vector<128x128xbf16>, vector<256x128xf32> -> vector<256x128xf32>
    %c1_17 = arith.constant 1 : index
    %c0_18 = arith.constant 0 : index
    %c0_19 = arith.constant 0 : index
    %22 = vector.load %arg5[%c1_17, %c0_18, %c0_19] : memref<2x1x128xf32, #tpu.memory_space<vmem>>, vector<1x1x128xf32>
    %23 = vector.shape_cast %22 : vector<1x1x128xf32> to vector<1x128xf32>
    %24 = vector.broadcast %23 : vector<1x128xf32> to vector<256x128xf32>
    %25 = arith.addf %21, %24 : vector<256x128xf32>
    %cst_20 = arith.constant 0.000000e+00 : f32
    %26 = vector.broadcast %cst_20 : f32 to vector<256x128xf32>
    %27 = arith.maximumf %25, %26 : vector<256x128xf32>
    %28 = arith.truncf %27 : vector<256x128xf32> to vector<256x128xbf16>
    %c0_21 = arith.constant 0 : index
    %c0_22 = arith.constant 0 : index
    %29 = vector.load %arg6[%c0_21, %c0_22] : memref<128x128xbf16, #tpu.memory_space<vmem>>, vector<128x128xbf16>
    %cst_23 = arith.constant dense<0.000000e+00> : vector<256x128xf32>
    %30 = tpu.matmul %28, %29, %cst_23 {dimension_numbers = #tpu.dot_dimension_numbers<[1], [0], [0], [1], [0, 0, 1, 1], [], []>} : vector<256x128xbf16>, vector<128x128xbf16>, vector<256x128xf32> -> vector<256x128xf32>
    %c0_24 = arith.constant 0 : index
    %c0_25 = arith.constant 0 : index
    %31 = vector.load %arg7[%c0_24, %c0_25] : memref<1x128xf32, #tpu.memory_space<vmem>>, vector<1x128xf32>
    %32 = vector.broadcast %31 : vector<1x128xf32> to vector<256x128xf32>
    %33 = arith.addf %30, %32 : vector<256x128xf32>
    %c0_26 = arith.constant 0 : index
    %c0_27 = arith.constant 0 : index
    %34 = vector.load %arg8[%c0_26, %c0_27] : memref<256x128xf32, #tpu.memory_space<vmem>>, vector<256x128xf32>
    tpu.vector_store %arg8[%c0_26, %c0_27], %33 {strides = array<i32>} : memref<256x128xf32, #tpu.memory_space<vmem>>, vector<256x128xf32>,
    return
  }
  func.func @transform_0(%arg0: i32) -> (i32, i32) {
    %c0_i32 = arith.constant 0 : i32
    %c0_i32_0 = arith.constant 0 : i32
    return %arg0, %c0_i32 : i32, i32
  }
  func.func @transform_1(%arg0: i32) -> (i32, i32) {
    %c0_i32 = arith.constant 0 : i32
    %c0_i32_0 = arith.constant 0 : i32
    %c0_i32_1 = arith.constant 0 : i32
    return %c0_i32, %c0_i32_0 : i32, i32
  }
  func.func @transform_2(%arg0: i32) -> (i32, i32) {
    %c0_i32 = arith.constant 0 : i32
    %c0_i32_0 = arith.constant 0 : i32
    %c0_i32_1 = arith.constant 0 : i32
    return %c0_i32, %c0_i32_0 : i32, i32
  }
  func.func @transform_3(%arg0: i32) -> (i32, i32, i32) {
    %c0_i32 = arith.constant 0 : i32
    %c0_i32_0 = arith.constant 0 : i32
    %c0_i32_1 = arith.constant 0 : i32
    %c0_i32_2 = arith.constant 0 : i32
    return %c0_i32, %c0_i32_0, %c0_i32_1 : i32, i32, i32
  }
  func.func @transform_4(%arg0: i32) -> (i32, i32, i32) {
    %c0_i32 = arith.constant 0 : i32
    %c0_i32_0 = arith.constant 0 : i32
    %c0_i32_1 = arith.constant 0 : i32
    %c0_i32_2 = arith.constant 0 : i32
    return %c0_i32, %c0_i32_0, %c0_i32_1 : i32, i32, i32
  }
  func.func @transform_5(%arg0: i32) -> (i32, i32) {
    %c0_i32 = arith.constant 0 : i32
    %c0_i32_0 = arith.constant 0 : i32
    %c0_i32_1 = arith.constant 0 : i32
    return %c0_i32, %c0_i32_0 : i32, i32
  }
  func.func @transform_6(%arg0: i32) -> (i32, i32) {
    %c0_i32 = arith.constant 0 : i32
    %c0_i32_0 = arith.constant 0 : i32
    %c0_i32_1 = arith.constant 0 : i32
    return %c0_i32, %c0_i32_0 : i32, i32
  }
  func.func @transform_7(%arg0: i32) -> (i32, i32) {
    %c0_i32 = arith.constant 0 : i32
    %c0_i32_0 = arith.constant 0 : i32
    return %arg0, %c0_i32 : i32, i32
  }
}

</mosaic_0001>

<bundles_post_ra>
// kernel: dqm_forward.1
= control target key start
LH: loop header
LB: loop body
LE: loop exit
PB: predicated region body
PF: predicated region fallthrough
CT: control target
= control target key end

     0   :  { %s2045_s24 = smov 0   ;;  %s2362_s0 = inlined_call_operand.vmem [shape: bf16[512,128], index: 0, kind: input, shape index: {}]   ;;  %s2363_s1 = inlined_call_operand.vmem [shape: bf16[128,128], index: 1, kind: input, shape index: {}]   ;;  %s2364_s2 = inlined_call_operand.vmem [shape: f32[1,128], index: 2, kind: input, shape index: {}]   ;;  %s2365_s3 = inlined_call_operand.vmem [shape: bf16[2,128,128], index: 3, kind: input, shape index: {}]   ;;  %s2366_s4 = inlined_call_operand.vmem [shape: f32[2,1,128], index: 4, kind: input, shape index: {}]   ;;  %s2367_s5 = inlined_call_operand.vmem [shape: bf16[128,128], index: 5, kind: input, shape index: {}]   ;;  %s2368_s6 = inlined_call_operand.vmem [shape: f32[1,128], index: 6, kind: input, shape index: {}]   ;;  %s2369_s7 = inlined_call_operand.vmem [shape: f32[512,128], index: 7, kind: output, shape index: {}]  }
   0x1 LB: > { %s1573_s25 = sadd.s32 4294967295, %s2003_s24   ;;  %p1577_p0 = scmp.ge.s32.totalorder %s2003_s24, 1  ;;  %s2003_s24 = sphi %s2045_s24, %s17_s24  }
   0x2   : > { %p238_p1 = scmp.lt.s32.totalorder %s2003_s24, 3 }
   0x4   : > { %p239_p2 = pnand %p1577_p0, %p238_p1 }
   0x5   : > { %v1949_v0 = vld [vmem:[%s2363_s1] sm:$0xff] (!%p239_p2)   ;;  %s1578_s28 = sshll.u32 (!%p239_p2), %s1573_s25, 5  ;;  %v1950_v1 = vld [vmem:[%s2363_s1 + $0x8] sm:$0xff] (!%p239_p2)   ;;  %v1951_v2 = vld [vmem:[%s2363_s1 + $0x10] sm:$0xff] (!%p239_p2)  }
   0x6   : > { %242 = sbr.rel (%p239_p2) target bundleno = 978 (0x3d2), region = 48  ;;  %p271_p3 = scmp.lt.s32.totalorder (!%p239_p2), %s1578_s28, 63  ;;  %1749 = vmatprep.subr.bf16.mxu0 (!%p239_p2), %v1949_v0  ;;  %v1952_v3 = vld [vmem:[%s2363_s1 + $0x18] sm:$0xff] (!%p239_p2)   ;;  %v1953_v5 = vld [vmem:[%s2363_s1 + $0x20] sm:$0xff] (!%p239_p2)   ;;  %v1954_v6 = vld [vmem:[%s2363_s1 + $0x28] sm:$0xff] (!%p239_p2)  }
   0x7   : > { %1750 = vmatpush3.bf16.msra.mxu0 (!%p239_p2), %v1949_v0  ;;  %v1955_v7 = vld [vmem:[%s2363_s1 + $0x30] sm:$0xff] (!%p239_p2)   ;;  %v1956_v8 = vld [vmem:[%s2363_s1 + $0x38] sm:$0xff] (!%p239_p2)   ;;  %v1973_v9 = vld [vmem:[%s2365_s3] sm:$0xff] (!%p239_p2)  }
   0x8   : > { %1751 = vmatprep.subr.bf16.mxu0 (!%p239_p2), %v1950_v1  ;;  %v1974_v10 = vld [vmem:[%s2365_s3 + $0x8] sm:$0xff] (!%p239_p2)   ;;  %1797 = vmatprep.subr.bf16.mxu1 (!%p239_p2), %v1973_v9  ;;  %v1975_v12 = vld [vmem:[%s2365_s3 + $0x10] sm:$0xff] (!%p239_p2)   ;;  %v1976_v14 = vld [vmem:[%s2365_s3 + $0x18] sm:$0xff] (!%p239_p2)  }
   0x9   : > { %1798 = vmatpush3.bf16.msra.mxu1 (!%p239_p2), %v1973_v9  ;;  %v1977_v15 = vld [vmem:[%s2365_s3 + $0x20] sm:$0xff] (!%p239_p2)   ;;  %v1978_v18 = vld [vmem:[%s2365_s3 + $0x28] sm:$0xff] (!%p239_p2)   ;;  %v1979_v30 = vld [vmem:[%s2365_s3 + $0x30] sm:$0xff] (!%p239_p2)  }
   0xa   : > { %1799 = vmatprep.subr.bf16.mxu1 (!%p239_p2), %v1974_v10  ;;  %v1980_v31 = vld [vmem:[%s2365_s3 + $0x38] sm:$0xff] (!%p239_p2)   ;;  %v1981_v32 = vld [vmem:[%s2365_s3 + $0x40] sm:$0xff] (!%p239_p2)   ;;  %v1982_v33 = vld [vmem:[%s2365_s3 + $0x48] sm:$0xff] (!%p239_p2)  }
   0xb   : > { %1752 = vmatpush3.bf16.msra.mxu0 (!%p239_p2), %v1950_v1  ;;  %v1983_v34 = vld [vmem:[%s2365_s3 + $0x50] sm:$0xff] (!%p239_p2)   ;;  %v1984_v35 = vld [vmem:[%s2365_s3 + $0x58] sm:$0xff] (!%p239_p2)   ;;  %v1985_v36 = vld [vmem:[%s2365_s3 + $0x60] sm:$0xff] (!%p239_p2)  }
   0xc   : > { %1753 = vmatprep.subr.bf16.mxu0 (!%p239_p2), %v1951_v2  ;;  %v1986_v37 = vld [vmem:[%s2365_s3 + $0x68] sm:$0xff] (!%p239_p2)   ;;  %v1987_v38 = vld [vmem:[%s2365_s3 + $0x70] sm:$0xff] (!%p239_p2)   ;;  %v2149_v39 = vld [vmem:[%s2364_s2] ss:$0 sm:$0xff] (!%p239_p2) }
   0xd   : > { %s2371_s28 = smov (!%p271_p3, %s1578_s28), 63  ;;  %1800 = vmatpush3.bf16.msra.mxu1 %v1974_v10 }
   0xe   : > { %s1579_s10 = sshll.u32 %s2371_s28, 2  ;;  %1801 = vmatprep.subr.bf16.mxu1 %v1975_v12  ;;  %s1581_s16 = sshll.u32 %s2371_s28, 3 }
   0xf   : > { %s2068_s13 = scalar_lea.vmem %s2362_s0, %s1579_s10  ;;  %1754 = vmatpush3.bf16.msra.mxu0 %v1951_v2  ;;  %s2293_s21 = scalar_lea.vmem %s2369_s7, %s1581_s16 }
  0x10   : > { %v1957_v4 = vld [vmem:[%s2068_s13] sm:$0xff]   ;;  %1755 = vmatprep.subr.bf16.mxu0 %v1952_v3  ;;  %v1958_v11 = vld [vmem:[%s2068_s13 + $0x8] sm:$0xff]   ;;  %v1959_v13 = vld [vmem:[%s2068_s13 + $0x10] sm:$0xff]  }
  0x11   : > { %1765 = vmatprep.mubr.bf16.mxu0 %v1957_v4  ;;  %1802 = vmatpush3.bf16.msra.mxu1 %v1975_v12  ;;  %v1960_v16 = vld [vmem:[%s2068_s13 + $0x18] sm:$0xff]   ;;  %v1961_v17 = vld [vmem:[%s2068_s13 + $0x20] sm:$0xff]   ;;  %v1962_v19 = vld [vmem:[%s2068_s13 + $0x28] sm:$0xff]  }
  0x12   : > { %1803 = vmatprep.subr.bf16.mxu1 %v1976_v14  ;;  %v1963_v20 = vld [vmem:[%s2068_s13 + $0x30] sm:$0xff]   ;;  %v1964_v21 = vld [vmem:[%s2068_s13 + $0x38] sm:$0xff]   ;;  %v1965_v22 = vld [vmem:[%s2068_s13 + $0x40] sm:$0xff]  }
  0x13   : > { %1756 = vmatpush3.bf16.msra.mxu0 %v1952_v3  ;;  %v1966_v23 = vld [vmem:[%s2068_s13 + $0x48] sm:$0xff]   ;;  %v1967_v24 = vld [vmem:[%s2068_s13 + $0x50] sm:$0xff]   ;;  %v1968_v25 = vld [vmem:[%s2068_s13 + $0x58] sm:$0xff]  }
  0x14   : > { %1757 = vmatprep.subr.bf16.mxu0 %v1953_v5  ;;  %v1969_v26 = vld [vmem:[%s2068_s13 + $0x60] sm:$0xff]   ;;  %v1970_v27 = vld [vmem:[%s2068_s13 + $0x68] sm:$0xff]   ;;  %v1971_v28 = vld [vmem:[%s2068_s13 + $0x70] sm:$0xff]  }
  0x15   : > { %1804 = vmatpush3.bf16.msra.mxu1 %v1976_v14  ;;  %v1972_v29 = vld [vmem:[%s2068_s13 + $0x78] sm:$0xff]  }
  0x16   : > { %1805 = vmatprep.subr.bf16.mxu1 %v1977_v15 }
  0x17   : > { %1758 = vmatpush3.bf16.msra.mxu0 %v1953_v5 }
  0x18   : > { %1759 = vmatprep.subr.bf16.mxu0 %v1954_v6 }
  0x19   : > { %1806 = vmatpush3.bf16.msra.mxu1 %v1977_v15 }
  0x1a   : > { %1807 = vmatprep.subr.bf16.mxu1 %v1978_v18 }
  0x1b   : > { %1760 = vmatpush3.bf16.msra.mxu0 %v1954_v6 }
  0x1c   : > { %1761 = vmatprep.subr.bf16.mxu0 %v1955_v7 }
  0x1d   : > { %1808 = vmatpush3.bf16.msra.mxu1 %v1978_v18 }
  0x1e   : > { %1809 = vmatprep.subr.bf16.mxu1 %v1979_v30 }
  0x1f   : > { %1762 = vmatpush3.bf16.msra.mxu0 %v1955_v7 }
  0x20   : > { %1763 = vmatprep.subr.bf16.mxu0 %v1956_v8 }
  0x21   : > { %1810 = vmatpush3.bf16.msra.mxu1 %v1979_v30 }
  0x22   : > { %1811 = vmatprep.subr.bf16.mxu1 %v1980_v31 }
  0x23   : > { %1764 = vmatpush3.bf16.msra.mxu0 %v1956_v8 }
  0x24   : > { %1845 = vmatprep.subr.bf16.mxu0 %v1981_v32 }
  0x25   : > { %1812 = vmatpush3.bf16.msra.mxu1 %v1980_v31 }
  0x26   : > { %1766 = vmatmul.mubr.bf16.vlgmr.msra.gmra.mrb[0].mxu0 %v1958_v11 }
  0x27   : > { %1769 = vmatprep.mubr.bf16.mxu0 %v1959_v13  ;;  %1846 = vmatpush3.bf16.msra.mxu0 %v1981_v32 }
  0x28   : > { %1847 = vmatprep.subr.bf16.mxu0 %v1982_v33 }
  0x2b   : > { %1848 = vmatpush3.bf16.msra.mxu0 %v1982_v33 }
  0x2c   : > { %1849 = vmatprep.subr.bf16.mxu0 %v1983_v34 }
  0x2e   : > { %1770 = vmatmul.mubr.bf16.gmra.mrb[4].mxu0 %v1960_v16 }
  0x2f   : > { %1773 = vmatprep.mubr.bf16.mxu0 %v1961_v17  ;;  %1850 = vmatpush3.bf16.msra.mxu0 %v1983_v34 }
  0x30   : > { %1851 = vmatprep.subr.bf16.mxu0 %v1984_v35 }
  0x33   : > { %1852 = vmatpush3.bf16.msra.mxu0 %v1984_v35 }
  0x34   : > { %1853 = vmatprep.subr.bf16.mxu0 %v1985_v36 }
  0x36   : > { %1774 = vmatmul.mubr.bf16.gmra.mrb[8].mxu0 %v1962_v19 }
  0x37   : > { %1777 = vmatprep.mubr.bf16.mxu0 %v1963_v20  ;;  %1854 = vmatpush3.bf16.msra.mxu0 %v1985_v36 }
  0x38   : > { %1855 = vmatprep.subr.bf16.mxu0 %v1986_v37 }
  0x3b   : > { %1856 = vmatpush3.bf16.msra.mxu0 %v1986_v37 }
  0x3c   : > { %1857 = vmatprep.subr.bf16.mxu0 %v1987_v38 }
  0x3e   : > { %1778 = vmatmul.mubr.bf16.gmra.mrb[12].mxu0 %v1964_v21 }
  0x3f   : > { %1781 = vmatprep.mubr.bf16.mxu0 %v1965_v22  ;;  %1858 = vmatpush3.bf16.msra.mxu0 %v1987_v38 }
  0x46   : > { %1782 = vmatmul.mubr.bf16.gmra.mrb[16].mxu0 %v1966_v23 }
  0x47   : > { %1785 = vmatprep.mubr.bf16.mxu0 %v1967_v24 }
  0x4e   : > { %1786 = vmatmul.mubr.bf16.gmra.mrb[20].mxu0 %v1968_v25 }
  0x4f   : > { %1789 = vmatprep.mubr.bf16.mxu0 %v1969_v26 }
  0x56   : > { %1790 = vmatmul.mubr.bf16.gmra.mrb[24].mxu0 %v1970_v27 }
  0x57   : > { %1793 = vmatprep.mubr.bf16.mxu0 %v1971_v28 }
  0x5e   : > { %1794 = vmatmul.mubr.bf16.gmra.mrb[28].mxu0 %v1972_v29 }
  0xf9   : > { %v1767_v40 = vpop.f32.mrb[0].mxu0 }
  0xfa   : > { %v525_v41 = vadd.f32 %v1767_v40, %v2149_v39  ;;  %v516_v42 = vpop.f32.mrb[1].mxu0 }
  0xfb   : > { %v517_v43 = vadd.f32 %v2149_v39, %v516_v42  ;;  %v1768_v44 = vpop.f32.mrb[2].mxu0 }
  0xfc   : > { %v528_v45 = vadd.f32 %v1768_v44, %v2149_v39  ;;  %v519_v46 = vpop.f32.mrb[3].mxu0  ;;  %v645_v48 = vmax.f32 %v525_v41, 0.0 }
  0xfd   : > { %v520_v47 = vadd.f32 %v2149_v39, %v519_v46  ;;  %v643_v50 = vmax.f32 %v517_v43, 0.0 }
  0xfe   : > { %v646_v49 = vmax.f32 %v528_v45, 0.0 }
  0xff   : > { %v644_v51 = vmax.f32 %v520_v47, 0.0 }
 0x100   : > { %v676_v52 = vpack.c.bf16 %v646_v49, %v645_v48 }
 0x101   : > { %v1771_v53 = vpop.f32.mrb[4].mxu0  ;;  %v675_v54 = vpack.c.bf16 %v644_v51, %v643_v50 }
 0x102   : > { %v541_v55 = vadd.f32 %v1771_v53, %v2149_v39  ;;  %v532_v56 = vpop.f32.mrb[5].mxu0 }
 0x103   : > { %v533_v57 = vadd.f32 %v2149_v39, %v532_v56  ;;  %v1772_v58 = vpop.f32.mrb[6].mxu0  ;;  %1813 = vmatprep.mubr.bf16.mxu1 %v675_v54 }
 0x104   : > { %v544_v59 = vadd.f32 %v1772_v58, %v2149_v39  ;;  %v535_v60 = vpop.f32.mrb[7].mxu0  ;;  %1814 = vmatmul.mubr.bf16.vlgmr.msra.gmra.mrb[0].mxu1 %v676_v52  ;;  %v649_v62 = vmax.f32 %v541_v55, 0.0 }
 0x105   : > { %v536_v61 = vadd.f32 %v2149_v39, %v535_v60  ;;  %v647_v0 = vmax.f32 %v533_v57, 0.0 }
 0x106   : > { %v650_v63 = vmax.f32 %v544_v59, 0.0 }
 0x107   : > { %v648_v1 = vmax.f32 %v536_v61, 0.0 }
 0x108   : > { %v678_v2 = vpack.c.bf16 %v650_v63, %v649_v62 }
 0x109   : > { %v677_v3 = vpack.c.bf16 %v648_v1, %v647_v0  ;;  %v1775_v4 = vpop.f32.mrb[8].mxu0 }
 0x10a   : > { %v557_v5 = vadd.f32 %v1775_v4, %v2149_v39  ;;  %v548_v6 = vpop.f32.mrb[9].mxu0 }
 0x10b   : > { %v549_v7 = vadd.f32 %v2149_v39, %v548_v6  ;;  %v1776_v8 = vpop.f32.mrb[10].mxu0  ;;  %1817 = vmatprep.mubr.bf16.mxu1 %v677_v3 }
 0x10c   : > { %v560_v9 = vadd.f32 %v1776_v8, %v2149_v39  ;;  %v551_v10 = vpop.f32.mrb[11].mxu0  ;;  %1818 = vmatmul.mubr.bf16.gmra.mrb[4].mxu1 %v678_v2  ;;  %v653_v12 = vmax.f32 %v557_v5, 0.0 }
 0x10d   : > { %v552_v11 = vadd.f32 %v2149_v39, %v551_v10  ;;  %v651_v14 = vmax.f32 %v549_v7, 0.0 }
 0x10e   : > { %v654_v13 = vmax.f32 %v560_v9, 0.0 }
 0x10f   : > { %v652_v15 = vmax.f32 %v552_v11, 0.0 }
 0x110   : > { %v680_v16 = vpack.c.bf16 %v654_v13, %v653_v12 }
 0x111   : > { %v679_v17 = vpack.c.bf16 %v652_v15, %v651_v14  ;;  %v1779_v18 = vpop.f32.mrb[12].mxu0 }
 0x112   : > { %v573_v19 = vadd.f32 %v1779_v18, %v2149_v39  ;;  %v564_v20 = vpop.f32.mrb[13].mxu0 }
 0x113   : > { %v565_v21 = vadd.f32 %v2149_v39, %v564_v20  ;;  %v1780_v22 = vpop.f32.mrb[14].mxu0  ;;  %1821 = vmatprep.mubr.bf16.mxu1 %v679_v17 }
 0x114   : > { %v576_v23 = vadd.f32 %v1780_v22, %v2149_v39  ;;  %v567_v24 = vpop.f32.mrb[15].mxu0  ;;  %1822 = vmatmul.mubr.bf16.gmra.mrb[8].mxu1 %v680_v16  ;;  %v657_v26 = vmax.f32 %v573_v19, 0.0 }
 0x115   : > { %v568_v25 = vadd.f32 %v2149_v39, %v567_v24  ;;  %v655_v28 = vmax.f32 %v565_v21, 0.0 }
 0x116   : > { %v658_v27 = vmax.f32 %v576_v23, 0.0 }
 0x117   : > { %v656_v29 = vmax.f32 %v568_v25, 0.0  ;;  %v1988_v25 = vld [vmem:[%s2365_s3 + $0x78] sm:$0xff]  }
 0x118   : > { %v682_v30 = vpack.c.bf16 %v658_v27, %v657_v26  ;;  %1859 = vmatprep.subr.bf16.mxu0 %v1988_v25  ;;  %v1989_v26 = vld [vmem:[%s2367_s5] sm:$0xff]   ;;  %v1991_v27 = vld [vmem:[%s2367_s5 + $0x10] sm:$0xff]  }
 0x119   : > { %v681_v31 = vpack.c.bf16 %v656_v29, %v655_v28  ;;  %v1783_v32 = vpop.f32.mrb[16].mxu0  ;;  %1860 = vmatpush3.bf16.msra.mxu0 %v1988_v25  ;;  %1893 = vmatprep.subr.bf16.mxu1 %v1989_v26  ;;  %v1992_v28 = vld [vmem:[%s2367_s5 + $0x18] sm:$0xff]   ;;  %v1993_v29 = vld [vmem:[%s2367_s5 + $0x20] sm:$0xff]  }
 0x11a   : > { %v589_v33 = vadd.f32 %v1783_v32, %v2149_v39  ;;  %v580_v34 = vpop.f32.mrb[17].mxu0  ;;  %1894 = vmatpush3.bf16.msra.mxu1 %v1989_v26  ;;  %v2210_v32 = vld [vmem:[%s2366_s4] ss:$0 sm:$0xff] }
 0x11b   : > { %v581_v35 = vadd.f32 %v2149_v39, %v580_v34  ;;  %v1784_v36 = vpop.f32.mrb[18].mxu0  ;;  %1825 = vmatprep.mubr.bf16.mxu1 %v681_v31  ;;  %v1995_v31 = vld [vmem:[%s2367_s5 + $0x30] sm:$0xff]  }
 0x11c   : > { %v592_v37 = vadd.f32 %v1784_v36, %v2149_v39  ;;  %v583_v38 = vpop.f32.mrb[19].mxu0  ;;  %1826 = vmatmul.mubr.bf16.gmra.mrb[12].mxu1 %v682_v30  ;;  %v661_v41 = vmax.f32 %v589_v33, 0.0  ;;  %v1994_v30 = vld [vmem:[%s2367_s5 + $0x28] sm:$0xff]  }
 0x11d   : > { %v584_v40 = vadd.f32 %v2149_v39, %v583_v38  ;;  %v659_v43 = vmax.f32 %v581_v35, 0.0 }
 0x11e   : > { %v662_v42 = vmax.f32 %v592_v37, 0.0 }
 0x11f   : > { %v660_v44 = vmax.f32 %v584_v40, 0.0 }
 0x120   : > { %v684_v45 = vpack.c.bf16 %v662_v42, %v661_v41 }
 0x121   : > { %v683_v46 = vpack.c.bf16 %v660_v44, %v659_v43  ;;  %v1787_v47 = vpop.f32.mrb[20].mxu0 }
 0x122   : > { %v605_v48 = vadd.f32 %v1787_v47, %v2149_v39  ;;  %v596_v49 = vpop.f32.mrb[21].mxu0 }
 0x123   : > { %v597_v50 = vadd.f32 %v2149_v39, %v596_v49  ;;  %v1788_v51 = vpop.f32.mrb[22].mxu0  ;;  %1829 = vmatprep.mubr.bf16.mxu1 %v683_v46 }
 0x124   : > { %v608_v52 = vadd.f32 %v1788_v51, %v2149_v39  ;;  %v599_v53 = vpop.f32.mrb[23].mxu0  ;;  %1830 = vmatmul.mubr.bf16.gmra.mrb[16].mxu1 %v684_v45  ;;  %v665_v55 = vmax.f32 %v605_v48, 0.0 }
 0x125   : > { %v600_v54 = vadd.f32 %v2149_v39, %v599_v53  ;;  %v663_v57 = vmax.f32 %v597_v50, 0.0 }
 0x126   : > { %v666_v56 = vmax.f32 %v608_v52, 0.0 }
 0x127   : > { %v664_v58 = vmax.f32 %v600_v54, 0.0 }
 0x128   : > { %v686_v59 = vpack.c.bf16 %v666_v56, %v665_v55 }
 0x129   : > { %v685_v60 = vpack.c.bf16 %v664_v58, %v663_v57  ;;  %v1791_v61 = vpop.f32.mrb[24].mxu0 }
 0x12a   : > { %v621_v62 = vadd.f32 %v1791_v61, %v2149_v39  ;;  %v612_v63 = vpop.f32.mrb[25].mxu0 }
 0x12b   : > { %v613_v0 = vadd.f32 %v2149_v39, %v612_v63  ;;  %v1792_v1 = vpop.f32.mrb[26].mxu0  ;;  %1833 = vmatprep.mubr.bf16.mxu1 %v685_v60 }
 0x12c   : > { %v624_v2 = vadd.f32 %v1792_v1, %v2149_v39  ;;  %v615_v3 = vpop.f32.mrb[27].mxu0  ;;  %1834 = vmatmul.mubr.bf16.gmra.mrb[20].mxu1 %v686_v59  ;;  %v669_v5 = vmax.f32 %v621_v62, 0.0 }
 0x12d   : > { %v616_v4 = vadd.f32 %v2149_v39, %v615_v3  ;;  %v667_v7 = vmax.f32 %v613_v0, 0.0 }
 0x12e   : > { %v670_v6 = vmax.f32 %v624_v2, 0.0 }
 0x12f   : > { %v668_v8 = vmax.f32 %v616_v4, 0.0 }
 0x130   : > { %v688_v9 = vpack.c.bf16 %v670_v6, %v669_v5 }
 0x131   : > { %v687_v10 = vpack.c.bf16 %v668_v8, %v667_v7  ;;  %v1795_v11 = vpop.f32.mrb[28].mxu0 }
 0x132   : > { %v637_v12 = vadd.f32 %v1795_v11, %v2149_v39  ;;  %v628_v13 = vpop.f32.mrb[29].mxu0 }
 0x133   : > { %v629_v14 = vadd.f32 %v2149_v39, %v628_v13  ;;  %v1796_v15 = vpop.f32.mrb[30].mxu0  ;;  %1837 = vmatprep.mubr.bf16.mxu1 %v687_v10 }
 0x134   : > { %v640_v16 = vadd.f32 %v1796_v15, %v2149_v39  ;;  %v631_v17 = vpop.f32.mrb[31].mxu0  ;;  %1838 = vmatmul.mubr.bf16.gmra.mrb[24].mxu1 %v688_v9  ;;  %v673_v19 = vmax.f32 %v637_v12, 0.0 }
 0x135   : > { %v632_v18 = vadd.f32 %v2149_v39, %v631_v17  ;;  %v671_v21 = vmax.f32 %v629_v14, 0.0  ;;  %v1990_v39 = vld [vmem:[%s2367_s5 + $0x8] sm:$0xff]  }
 0x136   : > { %v674_v20 = vmax.f32 %v640_v16, 0.0  ;;  %1895 = vmatprep.subr.bf16.mxu1 %v1990_v39 }
 0x137   : > { %v672_v22 = vmax.f32 %v632_v18, 0.0  ;;  %1896 = vmatpush3.bf16.msra.mxu1 %v1990_v39 }
 0x138   : > { %v690_v23 = vpack.c.bf16 %v674_v20, %v673_v19  ;;  %1897 = vmatprep.subr.bf16.mxu1 %v1991_v27 }
 0x139   : > { %v689_v24 = vpack.c.bf16 %v672_v22, %v671_v21 }
 0x13b   : > { %1841 = vmatprep.mubr.bf16.mxu1 %v689_v24  ;;  %1898 = vmatpush3.bf16.msra.mxu1 %v1991_v27 }
 0x13c   : > { %1842 = vmatmul.mubr.bf16.gmra.mrb[28].mxu1 %v690_v23  ;;  %1899 = vmatprep.subr.bf16.mxu1 %v1992_v28 }
 0x13f   : > { %1900 = vmatpush3.bf16.msra.mxu1 %v1992_v28 }
 0x140   : > { %1901 = vmatprep.subr.bf16.mxu1 %v1993_v29 }
 0x143   : > { %1902 = vmatpush3.bf16.msra.mxu1 %v1993_v29 }
 0x144   : > { %1903 = vmatprep.subr.bf16.mxu1 %v1994_v30 }
 0x147   : > { %1904 = vmatpush3.bf16.msra.mxu1 %v1994_v30 }
 0x148   : > { %1905 = vmatprep.subr.bf16.mxu1 %v1995_v31 }
 0x14b   : > { %1906 = vmatpush3.bf16.msra.mxu1 %v1995_v31 }
 0x1d7   : > { %v1815_v33 = vpop.f32.mrb[0].mxu1 }
 0x1d8   : > { %v805_v34 = vadd.f32 %v1815_v33, %v2210_v32  ;;  %v796_v35 = vpop.f32.mrb[1].mxu1 }
 0x1d9   : > { %v797_v36 = vadd.f32 %v2210_v32, %v796_v35  ;;  %v1816_v37 = vpop.f32.mrb[2].mxu1 }
 0x1da   : > { %v808_v38 = vadd.f32 %v1816_v37, %v2210_v32  ;;  %v799_v40 = vpop.f32.mrb[3].mxu1  ;;  %v925_v42 = vmax.f32 %v805_v34, 0.0 }
 0x1db   : > { %v800_v41 = vadd.f32 %v2210_v32, %v799_v40  ;;  %v923_v44 = vmax.f32 %v797_v36, 0.0 }
 0x1dc   : > { %v926_v43 = vmax.f32 %v808_v38, 0.0 }
 0x1dd   : > { %v924_v45 = vmax.f32 %v800_v41, 0.0 }
 0x1de   : > { %v956_v46 = vpack.c.bf16 %v926_v43, %v925_v42 }
 0x1df   : > { %v955_v47 = vpack.c.bf16 %v924_v45, %v923_v44  ;;  %v1819_v48 = vpop.f32.mrb[4].mxu1 }
 0x1e0   : > { %v821_v49 = vadd.f32 %v1819_v48, %v2210_v32  ;;  %v812_v50 = vpop.f32.mrb[5].mxu1 }
 0x1e1   : > { %v813_v51 = vadd.f32 %v2210_v32, %v812_v50  ;;  %v1820_v52 = vpop.f32.mrb[6].mxu1  ;;  %1861 = vmatprep.mubr.bf16.mxu0 %v955_v47 }
 0x1e2   : > { %v824_v53 = vadd.f32 %v1820_v52, %v2210_v32  ;;  %v815_v54 = vpop.f32.mrb[7].mxu1  ;;  %1862 = vmatmul.mubr.bf16.vlgmr.msra.gmra.mrb[32].mxu0 %v956_v46  ;;  %v929_v56 = vmax.f32 %v821_v49, 0.0 }
 0x1e3   : > { %v816_v55 = vadd.f32 %v2210_v32, %v815_v54  ;;  %v927_v58 = vmax.f32 %v813_v51, 0.0 }
 0x1e4   : > { %v930_v57 = vmax.f32 %v824_v53, 0.0 }
 0x1e5   : > { %v928_v59 = vmax.f32 %v816_v55, 0.0 }
 0x1e6   : > { %v958_v60 = vpack.c.bf16 %v930_v57, %v929_v56 }
 0x1e7   : > { %v957_v61 = vpack.c.bf16 %v928_v59, %v927_v58  ;;  %v1823_v62 = vpop.f32.mrb[8].mxu1 }
 0x1e8   : > { %v837_v63 = vadd.f32 %v1823_v62, %v2210_v32  ;;  %v828_v0 = vpop.f32.mrb[9].mxu1 }
 0x1e9   : > { %v829_v1 = vadd.f32 %v2210_v32, %v828_v0  ;;  %v1824_v2 = vpop.f32.mrb[10].mxu1  ;;  %1865 = vmatprep.mubr.bf16.mxu0 %v957_v61 }
 0x1ea   : > { %v840_v3 = vadd.f32 %v1824_v2, %v2210_v32  ;;  %v831_v4 = vpop.f32.mrb[11].mxu1  ;;  %1866 = vmatmul.mubr.bf16.gmra.mrb[36].mxu0 %v958_v60  ;;  %v933_v6 = vmax.f32 %v837_v63, 0.0 }
 0x1eb   : > { %v832_v5 = vadd.f32 %v2210_v32, %v831_v4  ;;  %v931_v8 = vmax.f32 %v829_v1, 0.0 }
 0x1ec   : > { %v934_v7 = vmax.f32 %v840_v3, 0.0 }
 0x1ed   : > { %v932_v9 = vmax.f32 %v832_v5, 0.0 }
 0x1ee   : > { %v960_v10 = vpack.c.bf16 %v934_v7, %v933_v6 }
 0x1ef   : > { %v959_v11 = vpack.c.bf16 %v932_v9, %v931_v8  ;;  %v1827_v12 = vpop.f32.mrb[12].mxu1 }
 0x1f0   : > { %v853_v13 = vadd.f32 %v1827_v12, %v2210_v32  ;;  %v844_v14 = vpop.f32.mrb[13].mxu1 }
 0x1f1   : > { %v845_v15 = vadd.f32 %v2210_v32, %v844_v14  ;;  %v1828_v16 = vpop.f32.mrb[14].mxu1  ;;  %1869 = vmatprep.mubr.bf16.mxu0 %v959_v11 }
 0x1f2   : > { %v856_v17 = vadd.f32 %v1828_v16, %v2210_v32  ;;  %v847_v18 = vpop.f32.mrb[15].mxu1  ;;  %1870 = vmatmul.mubr.bf16.gmra.mrb[40].mxu0 %v960_v10  ;;  %v937_v20 = vmax.f32 %v853_v13, 0.0 }
 0x1f3   : > { %v848_v19 = vadd.f32 %v2210_v32, %v847_v18  ;;  %v935_v22 = vmax.f32 %v845_v15, 0.0 }
 0x1f4   : > { %v938_v21 = vmax.f32 %v856_v17, 0.0 }
 0x1f5   : > { %v936_v23 = vmax.f32 %v848_v19, 0.0  ;;  %v1996_v19 = vld [vmem:[%s2367_s5 + $0x38] sm:$0xff]  }
 0x1f6   : > { %v962_v24 = vpack.c.bf16 %v938_v21, %v937_v20  ;;  %1907 = vmatprep.subr.bf16.mxu1 %v1996_v19  ;;  %v2250_v20 = vld [vmem:[%s2366_s4 + $0x1] ss:$0 sm:$0xff] }
 0x1f7   : > { %v961_v25 = vpack.c.bf16 %v936_v23, %v935_v22  ;;  %v1831_v26 = vpop.f32.mrb[16].mxu1  ;;  %1908 = vmatpush3.bf16.msra.mxu1 %v1996_v19 }
 0x1f8   : > { %v869_v39 = vadd.f32 %v1831_v26, %v2210_v32  ;;  %v860_v27 = vpop.f32.mrb[17].mxu1 }
 0x1f9   : > { %v861_v28 = vadd.f32 %v2210_v32, %v860_v27  ;;  %v1832_v29 = vpop.f32.mrb[18].mxu1  ;;  %1873 = vmatprep.mubr.bf16.mxu0 %v961_v25 }
 0x1fa   : > { %v872_v30 = vadd.f32 %v1832_v29, %v2210_v32  ;;  %v863_v31 = vpop.f32.mrb[19].mxu1  ;;  %1874 = vmatmul.mubr.bf16.gmra.mrb[44].mxu0 %v962_v24  ;;  %v941_v34 = vmax.f32 %v869_v39, 0.0 }
 0x1fb   : > { %v864_v33 = vadd.f32 %v2210_v32, %v863_v31  ;;  %v939_v36 = vmax.f32 %v861_v28, 0.0 }
 0x1fc   : > { %v942_v35 = vmax.f32 %v872_v30, 0.0 }
 0x1fd   : > { %v940_v37 = vmax.f32 %v864_v33, 0.0 }
 0x1fe   : > { %v964_v38 = vpack.c.bf16 %v942_v35, %v941_v34 }
 0x1ff   : > { %v963_v40 = vpack.c.bf16 %v940_v37, %v939_v36  ;;  %v1835_v41 = vpop.f32.mrb[20].mxu1 }
 0x200   : > { %v885_v42 = vadd.f32 %v1835_v41, %v2210_v32  ;;  %v876_v43 = vpop.f32.mrb[21].mxu1 }
 0x201   : > { %v877_v44 = vadd.f32 %v2210_v32, %v876_v43  ;;  %v1836_v45 = vpop.f32.mrb[22].mxu1  ;;  %1877 = vmatprep.mubr.bf16.mxu0 %v963_v40 }
 0x202   : > { %v888_v46 = vadd.f32 %v1836_v45, %v2210_v32  ;;  %v879_v47 = vpop.f32.mrb[23].mxu1  ;;  %1878 = vmatmul.mubr.bf16.gmra.mrb[48].mxu0 %v964_v38  ;;  %v945_v49 = vmax.f32 %v885_v42, 0.0 }
 0x203   : > { %v880_v48 = vadd.f32 %v2210_v32, %v879_v47  ;;  %v943_v51 = vmax.f32 %v877_v44, 0.0 }
 0x204   : > { %v946_v50 = vmax.f32 %v888_v46, 0.0 }
 0x205   : > { %v944_v52 = vmax.f32 %v880_v48, 0.0 }
 0x206   : > { %v966_v53 = vpack.c.bf16 %v946_v50, %v945_v49 }
 0x207   : > { %v965_v54 = vpack.c.bf16 %v944_v52, %v943_v51  ;;  %v1839_v55 = vpop.f32.mrb[24].mxu1 }
 0x208   : > { %v901_v56 = vadd.f32 %v1839_v55, %v2210_v32  ;;  %v892_v57 = vpop.f32.mrb[25].mxu1 }
 0x209   : > { %v893_v58 = vadd.f32 %v2210_v32, %v892_v57  ;;  %v1840_v59 = vpop.f32.mrb[26].mxu1  ;;  %1881 = vmatprep.mubr.bf16.mxu0 %v965_v54 }
 0x20a   : > { %v904_v60 = vadd.f32 %v1840_v59, %v2210_v32  ;;  %v895_v61 = vpop.f32.mrb[27].mxu1  ;;  %1882 = vmatmul.mubr.bf16.gmra.mrb[52].mxu0 %v966_v53  ;;  %v949_v63 = vmax.f32 %v901_v56, 0.0 }
 0x20b   : > { %v896_v62 = vadd.f32 %v2210_v32, %v895_v61  ;;  %v947_v1 = vmax.f32 %v893_v58, 0.0 }
 0x20c   : > { %v950_v0 = vmax.f32 %v904_v60, 0.0 }
 0x20d   : > { %v948_v2 = vmax.f32 %v896_v62, 0.0 }
 0x20e   : > { %v968_v3 = vpack.c.bf16 %v950_v0, %v949_v63 }
 0x20f   : > { %v967_v4 = vpack.c.bf16 %v948_v2, %v947_v1  ;;  %v1843_v5 = vpop.f32.mrb[28].mxu1 }
 0x210   : > { %v917_v6 = vadd.f32 %v1843_v5, %v2210_v32  ;;  %v908_v7 = vpop.f32.mrb[29].mxu1 }
 0x211   : > { %v909_v8 = vadd.f32 %v2210_v32, %v908_v7  ;;  %v1844_v9 = vpop.f32.mrb[30].mxu1  ;;  %1885 = vmatprep.mubr.bf16.mxu0 %v967_v4 }
 0x212   : > { %v920_v10 = vadd.f32 %v1844_v9, %v2210_v32  ;;  %v911_v11 = vpop.f32.mrb[31].mxu1  ;;  %1886 = vmatmul.mubr.bf16.gmra.mrb[56].mxu0 %v968_v3  ;;  %v953_v13 = vmax.f32 %v917_v6, 0.0 }
 0x213   : > { %v912_v12 = vadd.f32 %v2210_v32, %v911_v11  ;;  %v951_v15 = vmax.f32 %v909_v8, 0.0 }
 0x214   : > { %v954_v14 = vmax.f32 %v920_v10, 0.0 }
 0x215   : > { %v952_v16 = vmax.f32 %v912_v12, 0.0 }
 0x216   : > { %v970_v17 = vpack.c.bf16 %v954_v14, %v953_v13 }
 0x217   : > { %v969_v18 = vpack.c.bf16 %v952_v16, %v951_v15 }
 0x219   : > { %1889 = vmatprep.mubr.bf16.mxu0 %v969_v18 }
 0x21a   : > { %1890 = vmatmul.mubr.bf16.gmra.mrb[60].mxu0 %v970_v17 }
 0x2b5   : > { %v1863_v32 = vpop.f32.mrb[32].mxu0 }
 0x2b6   : > { %v1087_v21 = vadd.f32 %v1863_v32, %v2250_v20  ;;  %v1078_v22 = vpop.f32.mrb[33].mxu0 }
 0x2b7   : > { %v1079_v23 = vadd.f32 %v2250_v20, %v1078_v22  ;;  %v1864_v24 = vpop.f32.mrb[34].mxu0 }
 0x2b8   : > { %v1090_v25 = vadd.f32 %v1864_v24, %v2250_v20  ;;  %v1081_v26 = vpop.f32.mrb[35].mxu0  ;;  %v1207_v27 = vmax.f32 %v1087_v21, 0.0 }
 0x2b9   : > { %v1082_v39 = vadd.f32 %v2250_v20, %v1081_v26  ;;  %v1205_v29 = vmax.f32 %v1079_v23, 0.0 }
 0x2ba   : > { %v1208_v28 = vmax.f32 %v1090_v25, 0.0 }
 0x2bb   : > { %v1206_v30 = vmax.f32 %v1082_v39, 0.0 }
 0x2bc   : > { %v1238_v31 = vpack.c.bf16 %v1208_v28, %v1207_v27 }
 0x2bd   : > { %v1237_v33 = vpack.c.bf16 %v1206_v30, %v1205_v29  ;;  %v1867_v34 = vpop.f32.mrb[36].mxu0 }
 0x2be   : > { %v1103_v35 = vadd.f32 %v1867_v34, %v2250_v20  ;;  %v1094_v36 = vpop.f32.mrb[37].mxu0 }
 0x2bf   : > { %v1095_v37 = vadd.f32 %v2250_v20, %v1094_v36  ;;  %v1868_v38 = vpop.f32.mrb[38].mxu0  ;;  %1909 = vmatprep.mubr.bf16.mxu1 %v1237_v33 }
 0x2c0   : > { %v1106_v40 = vadd.f32 %v1868_v38, %v2250_v20  ;;  %v1097_v41 = vpop.f32.mrb[39].mxu0  ;;  %1910 = vmatmul.mubr.bf16.vlgmr.msra.gmra.mrb[32].mxu1 %v1238_v31  ;;  %v1211_v43 = vmax.f32 %v1103_v35, 0.0 }
 0x2c1   : > { %v1098_v42 = vadd.f32 %v2250_v20, %v1097_v41  ;;  %v1209_v45 = vmax.f32 %v1095_v37, 0.0 }
 0x2c2   : > { %v1212_v44 = vmax.f32 %v1106_v40, 0.0 }
 0x2c3   : > { %v1210_v46 = vmax.f32 %v1098_v42, 0.0 }
 0x2c4   : > { %v1240_v47 = vpack.c.bf16 %v1212_v44, %v1211_v43 }
 0x2c5   : > { %v1239_v48 = vpack.c.bf16 %v1210_v46, %v1209_v45  ;;  %v1871_v49 = vpop.f32.mrb[40].mxu0 }
 0x2c6   : > { %v1119_v50 = vadd.f32 %v1871_v49, %v2250_v20  ;;  %v1110_v51 = vpop.f32.mrb[41].mxu0 }
 0x2c7   : > { %v1111_v52 = vadd.f32 %v2250_v20, %v1110_v51  ;;  %v1872_v53 = vpop.f32.mrb[42].mxu0  ;;  %1913 = vmatprep.mubr.bf16.mxu1 %v1239_v48 }
 0x2c8   : > { %v1122_v54 = vadd.f32 %v1872_v53, %v2250_v20  ;;  %v1113_v55 = vpop.f32.mrb[43].mxu0  ;;  %1914 = vmatmul.mubr.bf16.gmra.mrb[36].mxu1 %v1240_v47  ;;  %v1215_v57 = vmax.f32 %v1119_v50, 0.0 }
 0x2c9   : > { %v1114_v56 = vadd.f32 %v2250_v20, %v1113_v55  ;;  %v1213_v59 = vmax.f32 %v1111_v52, 0.0 }
 0x2ca   : > { %v1216_v58 = vmax.f32 %v1122_v54, 0.0 }
 0x2cb   : > { %v1214_v60 = vmax.f32 %v1114_v56, 0.0 }
 0x2cc   : > { %v1242_v61 = vpack.c.bf16 %v1216_v58, %v1215_v57 }
 0x2cd   : > { %v1241_v62 = vpack.c.bf16 %v1214_v60, %v1213_v59  ;;  %v1875_v63 = vpop.f32.mrb[44].mxu0 }
 0x2ce   : > { %v1135_v0 = vadd.f32 %v1875_v63, %v2250_v20  ;;  %v1126_v1 = vpop.f32.mrb[45].mxu0 }
 0x2cf   : > { %v1127_v2 = vadd.f32 %v2250_v20, %v1126_v1  ;;  %v1876_v3 = vpop.f32.mrb[46].mxu0  ;;  %1917 = vmatprep.mubr.bf16.mxu1 %v1241_v62 }
 0x2d0   : > { %v1138_v4 = vadd.f32 %v1876_v3, %v2250_v20  ;;  %v1129_v5 = vpop.f32.mrb[47].mxu0  ;;  %1918 = vmatmul.mubr.bf16.gmra.mrb[40].mxu1 %v1242_v61  ;;  %v1219_v7 = vmax.f32 %v1135_v0, 0.0 }
 0x2d1   : > { %v1130_v6 = vadd.f32 %v2250_v20, %v1129_v5  ;;  %v1217_v9 = vmax.f32 %v1127_v2, 0.0 }
 0x2d2   : > { %v1220_v8 = vmax.f32 %v1138_v4, 0.0 }
 0x2d3   : > { %v1218_v10 = vmax.f32 %v1130_v6, 0.0  ;;  %v2288_v6 = vld [vmem:[%s2368_s6] ss:$0 sm:$0xff] }
 0x2d4   : > { %v1244_v11 = vpack.c.bf16 %v1220_v8, %v1219_v7 }
 0x2d5   : > { %v1243_v12 = vpack.c.bf16 %v1218_v10, %v1217_v9  ;;  %v1879_v13 = vpop.f32.mrb[48].mxu0 }
 0x2d6   : > { %v1151_v14 = vadd.f32 %v1879_v13, %v2250_v20  ;;  %v1142_v15 = vpop.f32.mrb[49].mxu0 }
 0x2d7   : > { %v1143_v16 = vadd.f32 %v2250_v20, %v1142_v15  ;;  %v1880_v17 = vpop.f32.mrb[50].mxu0  ;;  %1921 = vmatprep.mubr.bf16.mxu1 %v1243_v12 }
 0x2d8   : > { %v1154_v18 = vadd.f32 %v1880_v17, %v2250_v20  ;;  %v1145_v19 = vpop.f32.mrb[51].mxu0  ;;  %1922 = vmatmul.mubr.bf16.gmra.mrb[44].mxu1 %v1244_v11  ;;  %v1223_v21 = vmax.f32 %v1151_v14, 0.0 }
 0x2d9   : > { %v1146_v32 = vadd.f32 %v2250_v20, %v1145_v19  ;;  %v1221_v23 = vmax.f32 %v1143_v16, 0.0 }
 0x2da   : > { %v1224_v22 = vmax.f32 %v1154_v18, 0.0 }
 0x2db   : > { %v1222_v24 = vmax.f32 %v1146_v32, 0.0 }
 0x2dc   : > { %v1246_v25 = vpack.c.bf16 %v1224_v22, %v1223_v21 }
 0x2dd   : > { %v1245_v26 = vpack.c.bf16 %v1222_v24, %v1221_v23  ;;  %v1883_v39 = vpop.f32.mrb[52].mxu0 }
 0x2de   : > { %v1167_v27 = vadd.f32 %v1883_v39, %v2250_v20  ;;  %v1158_v28 = vpop.f32.mrb[53].mxu0 }
 0x2df   : > { %v1159_v29 = vadd.f32 %v2250_v20, %v1158_v28  ;;  %v1884_v30 = vpop.f32.mrb[54].mxu0  ;;  %1925 = vmatprep.mubr.bf16.mxu1 %v1245_v26 }
 0x2e0   : > { %v1170_v31 = vadd.f32 %v1884_v30, %v2250_v20  ;;  %v1161_v33 = vpop.f32.mrb[55].mxu0  ;;  %1926 = vmatmul.mubr.bf16.gmra.mrb[48].mxu1 %v1246_v25  ;;  %v1227_v35 = vmax.f32 %v1167_v27, 0.0 }
 0x2e1   : > { %v1162_v34 = vadd.f32 %v2250_v20, %v1161_v33  ;;  %v1225_v37 = vmax.f32 %v1159_v29, 0.0 }
 0x2e2   : > { %v1228_v36 = vmax.f32 %v1170_v31, 0.0 }
 0x2e3   : > { %v1226_v38 = vmax.f32 %v1162_v34, 0.0 }
 0x2e4   : > { %v1248_v40 = vpack.c.bf16 %v1228_v36, %v1227_v35 }
 0x2e5   : > { %v1247_v41 = vpack.c.bf16 %v1226_v38, %v1225_v37  ;;  %v1887_v42 = vpop.f32.mrb[56].mxu0 }
 0x2e6   : > { %v1183_v43 = vadd.f32 %v1887_v42, %v2250_v20  ;;  %v1174_v44 = vpop.f32.mrb[57].mxu0 }
 0x2e7   : > { %v1175_v45 = vadd.f32 %v2250_v20, %v1174_v44  ;;  %v1888_v46 = vpop.f32.mrb[58].mxu0  ;;  %1929 = vmatprep.mubr.bf16.mxu1 %v1247_v41 }
 0x2e8   : > { %v1186_v47 = vadd.f32 %v1888_v46, %v2250_v20  ;;  %v1177_v48 = vpop.f32.mrb[59].mxu0  ;;  %1930 = vmatmul.mubr.bf16.gmra.mrb[52].mxu1 %v1248_v40  ;;  %v1231_v50 = vmax.f32 %v1183_v43, 0.0 }
 0x2e9   : > { %v1178_v49 = vadd.f32 %v2250_v20, %v1177_v48  ;;  %v1229_v52 = vmax.f32 %v1175_v45, 0.0 }
 0x2ea   : > { %v1232_v51 = vmax.f32 %v1186_v47, 0.0 }
 0x2eb   : > { %v1230_v53 = vmax.f32 %v1178_v49, 0.0 }
 0x2ec   : > { %v1250_v54 = vpack.c.bf16 %v1232_v51, %v1231_v50 }
 0x2ed   : > { %v1249_v55 = vpack.c.bf16 %v1230_v53, %v1229_v52  ;;  %v1891_v56 = vpop.f32.mrb[60].mxu0 }
 0x2ee   : > { %v1199_v57 = vadd.f32 %v1891_v56, %v2250_v20  ;;  %v1190_v58 = vpop.f32.mrb[61].mxu0 }
 0x2ef   : > { %v1191_v59 = vadd.f32 %v2250_v20, %v1190_v58  ;;  %v1892_v60 = vpop.f32.mrb[62].mxu0  ;;  %1933 = vmatprep.mubr.bf16.mxu1 %v1249_v55 }
 0x2f0   : > { %v1202_v61 = vadd.f32 %v1892_v60, %v2250_v20  ;;  %v1193_v62 = vpop.f32.mrb[63].mxu0  ;;  %1934 = vmatmul.mubr.bf16.gmra.mrb[56].mxu1 %v1250_v54  ;;  %v1235_v0 = vmax.f32 %v1199_v57, 0.0 }
 0x2f1   : > { %v1194_v63 = vadd.f32 %v2250_v20, %v1193_v62  ;;  %v1233_v2 = vmax.f32 %v1191_v59, 0.0 }
 0x2f2   : > { %v1236_v1 = vmax.f32 %v1202_v61, 0.0 }
 0x2f3   : > { %v1234_v3 = vmax.f32 %v1194_v63, 0.0 }
 0x2f4   : > { %v1252_v4 = vpack.c.bf16 %v1236_v1, %v1235_v0 }
 0x2f5   : > { %v1251_v5 = vpack.c.bf16 %v1234_v3, %v1233_v2 }
 0x2f7   : > { %1937 = vmatprep.mubr.bf16.mxu1 %v1251_v5 }
 0x2f8   : > { %1938 = vmatmul.mubr.bf16.gmra.mrb[60].mxu1 %v1252_v4 }
 0x393   : > { %v1911_v20 = vpop.f32.mrb[32].mxu1 }
 0x394   : > { %v1367_v7 = vadd.f32 %v1911_v20, %v2288_v6  ;;  %v1358_v8 = vpop.f32.mrb[33].mxu1 }
 0x395   : > { %v1359_v9 = vadd.f32 %v2288_v6, %v1358_v8  ;;  %v1912_v10 = vpop.f32.mrb[34].mxu1 }
 0x396   : > { %1487 = vst [vmem:[%s2293_s21 + $0x10] sm:$0xff] %v1367_v7  ;;  %v1370_v11 = vadd.f32 %v1912_v10, %v2288_v6  ;;  %v1361_v12 = vpop.f32.mrb[35].mxu1 }
 0x397   : > { %1485 = vst [vmem:[%s2293_s21] sm:$0xff] %v1359_v9  ;;  %v1362_v13 = vadd.f32 %v2288_v6, %v1361_v12 }
 0x398   : > { %1488 = vst [vmem:[%s2293_s21 + $0x18] sm:$0xff] %v1370_v11 }
 0x399   : > { %1486 = vst [vmem:[%s2293_s21 + $0x8] sm:$0xff] %v1362_v13 }
 0x39b   : > { %v1915_v14 = vpop.f32.mrb[36].mxu1 }
 0x39c   : > { %v1383_v15 = vadd.f32 %v1915_v14, %v2288_v6  ;;  %v1374_v16 = vpop.f32.mrb[37].mxu1 }
 0x39d   : > { %v1375_v17 = vadd.f32 %v2288_v6, %v1374_v16  ;;  %v1916_v18 = vpop.f32.mrb[38].mxu1 }
 0x39e   : > { %1491 = vst [vmem:[%s2293_s21 + $0x30] sm:$0xff] %v1383_v15  ;;  %v1386_v19 = vadd.f32 %v1916_v18, %v2288_v6  ;;  %v1377_v32 = vpop.f32.mrb[39].mxu1 }
 0x39f   : > { %1489 = vst [vmem:[%s2293_s21 + $0x20] sm:$0xff] %v1375_v17  ;;  %v1378_v21 = vadd.f32 %v2288_v6, %v1377_v32 }
 0x3a0   : > { %1492 = vst [vmem:[%s2293_s21 + $0x38] sm:$0xff] %v1386_v19 }
 0x3a1   : > { %1490 = vst [vmem:[%s2293_s21 + $0x28] sm:$0xff] %v1378_v21 }
 0x3a3   : > { %v1919_v22 = vpop.f32.mrb[40].mxu1 }
 0x3a4   : > { %v1399_v23 = vadd.f32 %v1919_v22, %v2288_v6  ;;  %v1390_v24 = vpop.f32.mrb[41].mxu1 }
 0x3a5   : > { %v1391_v25 = vadd.f32 %v2288_v6, %v1390_v24  ;;  %v1920_v26 = vpop.f32.mrb[42].mxu1 }
 0x3a6   : > { %1495 = vst [vmem:[%s2293_s21 + $0x50] sm:$0xff] %v1399_v23  ;;  %v1402_v39 = vadd.f32 %v1920_v26, %v2288_v6  ;;  %v1393_v27 = vpop.f32.mrb[43].mxu1 }
 0x3a7   : > { %1493 = vst [vmem:[%s2293_s21 + $0x40] sm:$0xff] %v1391_v25  ;;  %v1394_v28 = vadd.f32 %v2288_v6, %v1393_v27 }
 0x3a8   : > { %1496 = vst [vmem:[%s2293_s21 + $0x58] sm:$0xff] %v1402_v39 }
 0x3a9   : > { %1494 = vst [vmem:[%s2293_s21 + $0x48] sm:$0xff] %v1394_v28 }
 0x3ab   : > { %v1923_v29 = vpop.f32.mrb[44].mxu1 }
 0x3ac   : > { %v1415_v30 = vadd.f32 %v1923_v29, %v2288_v6  ;;  %v1406_v31 = vpop.f32.mrb[45].mxu1 }
 0x3ad   : > { %v1407_v33 = vadd.f32 %v2288_v6, %v1406_v31  ;;  %v1924_v34 = vpop.f32.mrb[46].mxu1 }
 0x3ae   : > { %1499 = vst [vmem:[%s2293_s21 + $0x70] sm:$0xff] %v1415_v30  ;;  %v1418_v35 = vadd.f32 %v1924_v34, %v2288_v6  ;;  %v1409_v36 = vpop.f32.mrb[47].mxu1 }
 0x3af   : > { %1497 = vst [vmem:[%s2293_s21 + $0x60] sm:$0xff] %v1407_v33  ;;  %v1410_v37 = vadd.f32 %v2288_v6, %v1409_v36 }
 0x3b0   : > { %1500 = vst [vmem:[%s2293_s21 + $0x78] sm:$0xff] %v1418_v35 }
 0x3b1   : > { %1498 = vst [vmem:[%s2293_s21 + $0x68] sm:$0xff] %v1410_v37 }
 0x3b3   : > { %v1927_v38 = vpop.f32.mrb[48].mxu1 }
 0x3b4   : > { %v1431_v40 = vadd.f32 %v1927_v38, %v2288_v6  ;;  %v1422_v41 = vpop.f32.mrb[49].mxu1 }
 0x3b5   : > { %v1423_v42 = vadd.f32 %v2288_v6, %v1422_v41  ;;  %v1928_v43 = vpop.f32.mrb[50].mxu1 }
 0x3b6   : > { %1503 = vst [vmem:[%s2293_s21 + $0x90] sm:$0xff] %v1431_v40  ;;  %v1434_v44 = vadd.f32 %v1928_v43, %v2288_v6  ;;  %v1425_v45 = vpop.f32.mrb[51].mxu1 }
 0x3b7   : > { %1501 = vst [vmem:[%s2293_s21 + $0x80] sm:$0xff] %v1423_v42  ;;  %v1426_v46 = vadd.f32 %v2288_v6, %v1425_v45 }
 0x3b8   : > { %1504 = vst [vmem:[%s2293_s21 + $0x98] sm:$0xff] %v1434_v44 }
 0x3b9   : > { %1502 = vst [vmem:[%s2293_s21 + $0x88] sm:$0xff] %v1426_v46 }
 0x3bb   : > { %v1931_v47 = vpop.f32.mrb[52].mxu1 }
 0x3bc   : > { %v1447_v48 = vadd.f32 %v1931_v47, %v2288_v6  ;;  %v1438_v49 = vpop.f32.mrb[53].mxu1 }
 0x3bd   : > { %v1439_v50 = vadd.f32 %v2288_v6, %v1438_v49  ;;  %v1932_v51 = vpop.f32.mrb[54].mxu1 }
 0x3be   : > { %1507 = vst [vmem:[%s2293_s21 + $0xb0] sm:$0xff] %v1447_v48  ;;  %v1450_v52 = vadd.f32 %v1932_v51, %v2288_v6  ;;  %v1441_v53 = vpop.f32.mrb[55].mxu1 }
 0x3bf   : > { %1505 = vst [vmem:[%s2293_s21 + $0xa0] sm:$0xff] %v1439_v50  ;;  %v1442_v54 = vadd.f32 %v2288_v6, %v1441_v53 }
 0x3c0   : > { %1508 = vst [vmem:[%s2293_s21 + $0xb8] sm:$0xff] %v1450_v52 }
 0x3c1   : > { %1506 = vst [vmem:[%s2293_s21 + $0xa8] sm:$0xff] %v1442_v54 }
 0x3c3   : > { %v1935_v55 = vpop.f32.mrb[56].mxu1 }
 0x3c4   : > { %v1463_v56 = vadd.f32 %v1935_v55, %v2288_v6  ;;  %v1454_v57 = vpop.f32.mrb[57].mxu1 }
 0x3c5   : > { %v1455_v58 = vadd.f32 %v2288_v6, %v1454_v57  ;;  %v1936_v59 = vpop.f32.mrb[58].mxu1 }
 0x3c6   : > { %1511 = vst [vmem:[%s2293_s21 + $0xd0] sm:$0xff] %v1463_v56  ;;  %v1466_v60 = vadd.f32 %v1936_v59, %v2288_v6  ;;  %v1457_v61 = vpop.f32.mrb[59].mxu1 }
 0x3c7   : > { %1509 = vst [vmem:[%s2293_s21 + $0xc0] sm:$0xff] %v1455_v58  ;;  %v1458_v62 = vadd.f32 %v2288_v6, %v1457_v61 }
 0x3c8   : > { %1512 = vst [vmem:[%s2293_s21 + $0xd8] sm:$0xff] %v1466_v60 }
 0x3c9   : > { %1510 = vst [vmem:[%s2293_s21 + $0xc8] sm:$0xff] %v1458_v62 }
 0x3cb   : > { %v1939_v63 = vpop.f32.mrb[60].mxu1 }
 0x3cc   : > { %v1479_v0 = vadd.f32 %v1939_v63, %v2288_v6  ;;  %v1470_v1 = vpop.f32.mrb[61].mxu1 }
 0x3cd   : > { %v1471_v2 = vadd.f32 %v2288_v6, %v1470_v1  ;;  %v1940_v3 = vpop.f32.mrb[62].mxu1 }
 0x3ce   : > { %1515 = vst [vmem:[%s2293_s21 + $0xf0] sm:$0xff] %v1479_v0  ;;  %v1482_v4 = vadd.f32 %v1940_v3, %v2288_v6  ;;  %v1473_v5 = vpop.f32.mrb[63].mxu1 }
 0x3cf   : > { %1513 = vst [vmem:[%s2293_s21 + $0xe0] sm:$0xff] %v1471_v2  ;;  %v1474_v20 = vadd.f32 %v2288_v6, %v1473_v5 }
 0x3d0   : > { %1516 = vst [vmem:[%s2293_s21 + $0xf8] sm:$0xff] %v1482_v4 }
 0x3d1   : > { %1514 = vst [vmem:[%s2293_s21 + $0xe8] sm:$0xff] %v1474_v20 }
 0x3d2 PF: > { %s17_s24 = sadd.s32 1, %s2003_s24  }
 0x3d3   : > { %p14_p4 = scmp.ge.s32.totalorder %s17_s24, 4  }
 0x3d5   :  { %16 = sbr.rel (!%p14_p4) target bundleno = 1 (0x1), region = 80 }

</bundles_post_ra>
